<compile_context>
chip_gen: v6e
topology: v6e:2x2x1
jax: 0.10.0
libtpu: 0.0.40
codegen_flags: <defaults>
</compile_context>

<pallas_src>
import functools

import jax
import jax.numpy as jnp
from jax.experimental import pallas as pl
from jax.experimental.pallas import tpu as pltpu

_NEG_INF = -3.0e38   # "no node seen yet" sentinel for max pooling


def _round_up(a, b):
    return ((a + b - 1) // b) * b


def graph_head_kernel(batch_ref, x_ref, w1_ref, b1_ref, a1_ref, w2_ref, b2_ref,
                      out_ref, emb_ref, cnt_ref, *, pooling_type, n_nodes,
                      ragged):
    k = pl.program_id(0)
    last = pl.num_programs(0) - 1
    Gp, dim_in = emb_ref.shape
    TN = x_ref.shape[0]

    @pl.when(k == 0)
    def _init():
        if pooling_type == "max":
            emb_ref[...] = jnp.full_like(emb_ref, _NEG_INF)
        else:
            emb_ref[...] = jnp.zeros_like(emb_ref)
        if pooling_type == "mean":
            cnt_ref[...] = jnp.zeros_like(cnt_ref)

    if pooling_type in ("add", "mean"):
        # batch ids as a lane-dense (1, TN) row; one-hot built directly as
        # [Gp, TN] so the pooling is a plain onehot @ x MXU contraction.
        bidx = batch_ref[...]                                          # (1, TN)
        rows = k * TN + jax.lax.broadcasted_iota(jnp.int32, (1, TN), 1)
        valid = rows < n_nodes                                         # ragged-tail gate
        gid = jax.lax.broadcasted_iota(jnp.int32, (Gp, TN), 0)
        mask = (bidx == gid) & valid                                   # (Gp, TN)

        x = x_ref[...]                                                 # (TN, dim_in) native dtype
        if ragged:
            # Zero garbage rows of the ragged last block: stale VMEM could be
            # NaN and 0 * NaN would poison the MXU accumulation.
            rows_c = k * TN + jax.lax.broadcasted_iota(jnp.int32, (TN, 1), 0)
            x = jnp.where(rows_c < n_nodes, x, 0).astype(x_ref.dtype)

        onehot = mask.astype(x.dtype)                                  # 0/1, exact in bf16 too
        emb_ref[...] += jnp.dot(onehot, x,
                                preferred_element_type=jnp.float32)    # (Gp, dim_in)
        if pooling_type == "mean":
            # node counts: lane reduce of the mask (XLU; hidden under the DMA)
            cnt_ref[...] += jnp.sum(mask.astype(jnp.float32), axis=1,
                                    keepdims=True)                     # (Gp, 1)
    else:
        # max pooling: per-graph running max in the natural (node-sublane,
        # feature-lane) layout; working set is one (TN, dim_in) tile, never a
        # [TN, Gp, dim_in] 3-D broadcast.
        bidx = batch_ref[...]                                          # (TN, 1)
        rows = k * TN + jax.lax.broadcasted_iota(jnp.int32, (TN, 1), 0)
        valid = rows < n_nodes                                         # (TN, 1)
        xf = x_ref[...].astype(jnp.float32)                            # (TN, dim_in)

        def gbody(g, emb):
            mg = (bidx == g) & valid                                   # (TN, 1)
            xm = jnp.where(mg, xf, _NEG_INF)                           # (TN, dim_in)
            rmax = jnp.max(xm, axis=0, keepdims=True)                  # (1, dim_in)
            gsel = jax.lax.broadcasted_iota(jnp.int32, (Gp, 1), 0) == g
            return jnp.where(gsel, jnp.maximum(emb, rmax), emb)

        emb_ref[...] = jax.lax.fori_loop(0, Gp, gbody, emb_ref[...],
                                         unroll=(Gp <= 16))

    @pl.when(k == last)
    def _finalize():
        emb = emb_ref[...]
        if pooling_type == "mean":
            # exact f32 division (approx reciprocal dropped for numerical
            # parity with segment_sum / PyTorch)
            emb = emb / jnp.maximum(cnt_ref[...], 1.0)
        elif pooling_type == "max":
            # empty graphs -> 0 (PyG scatter-'max' zero-init convention)
            emb = jnp.where(emb <= _NEG_INF, 0.0, emb)

        h = jnp.dot(emb.astype(w1_ref.dtype), w1_ref[...],
                    preferred_element_type=jnp.float32) + b1_ref[...].astype(jnp.float32)
        a = a1_ref[0, 0]                              # shared PReLU slope (SMEM scalar)
        h = jnp.where(h >= 0.0, h, a * h)
        out = jnp.dot(h.astype(w2_ref.dtype), w2_ref[...],
                      preferred_element_type=jnp.float32) + b2_ref[...].astype(jnp.float32)
        out_ref[...] = out.astype(out_ref.dtype)


def graph_head_forward(x, batch_idx, params, *, num_graphs, pooling_type,
                       tile_n=None, vmem_limit_bytes=48 * 1024 * 1024):
    """x: [N, dim_in] (f32 or bf16), batch_idx: [N] int, params: MLP weights.

    tile_n: node rows streamed per grid step. Defaults: 2048 (add/mean),
    256 (max). On v5e/v6e (128 MiB VMEM) both tile_n and vmem_limit_bytes can
    be raised further; the 48 MiB default is sized to be safe on v7x (64 MiB).
    """
    N, dim_in = x.shape
    w1, b1, a1, w2, b2 = (params["w1"], params["b1"], params["a1"],
                          params["w2"], params["b2"])
    dim_inner = w1.shape[1]
    dim_out = w2.shape[1]

    Gp = _round_up(max(num_graphs, 1), 8)

    if tile_n is None:
        tile_n = 2048 if pooling_type in ("add", "mean") else 256
    itemsize = jnp.dtype(x.dtype).itemsize
    # keep the double-buffered x stream comfortably inside the VMEM budget
    cap = max(128, (8 * 1024 * 1024) // (2 * max(dim_in, 1) * itemsize))
    TN = min(int(tile_n), cap)
    TN = max(128, (TN // 128) * 128)   # multiple of 128: lane-legal batch row,
                                       # sublane-legal x block, bf16/int8 packing
    if TN >= N:
        TN, n_tiles = N, 1             # single full-extent block (always legal)
    else:
        n_tiles = pl.cdiv(N, TN)
    ragged = (n_tiles * TN != N)

    bidx = batch_idx.astype(jnp.int32)
    if pooling_type in ("add", "mean"):
        batch_arr = bidx.reshape(1, N)                        # lane-dense row
        batch_spec = pl.BlockSpec((1, TN), lambda k: (0, k))
    else:
        batch_arr = bidx.reshape(N, 1)                        # node-sublane column
        batch_spec = pl.BlockSpec((TN, 1), lambda k: (k, 0))

    b1_2d = jnp.asarray(b1).reshape(1, dim_inner)
    b2_2d = jnp.asarray(b2).reshape(1, dim_out)
    a1_2d = jnp.asarray(a1, jnp.float32).reshape(1, 1)

    kernel = functools.partial(graph_head_kernel, pooling_type=pooling_type,
                               n_nodes=N, ragged=ragged)

    out_p = pl.pallas_call(
        kernel,
        out_shape=jax.ShapeDtypeStruct((Gp, dim_out), jnp.float32),
        grid_spec=pltpu.PrefetchScalarGridSpec(
            num_scalar_prefetch=0,
            grid=(n_tiles,),
            in_specs=[
                batch_spec,                                              # graph ids (tiled)
                pl.BlockSpec((TN, dim_in), lambda k: (k, 0)),            # x tile (pipelined, unpadded)
                pl.BlockSpec((dim_in, dim_inner), lambda k: (0, 0)),     # w1 (VMEM resident)
                pl.BlockSpec((1, dim_inner), lambda k: (0, 0)),          # b1
                pl.BlockSpec(memory_space=pltpu.MemorySpace.SMEM),       # PReLU slope scalar
                pl.BlockSpec((dim_inner, dim_out), lambda k: (0, 0)),    # w2
                pl.BlockSpec((1, dim_out), lambda k: (0, 0)),            # b2
            ],
            out_specs=pl.BlockSpec((Gp, dim_out), lambda k: (0, 0)),     # constant -> resident
            scratch_shapes=[pltpu.VMEM((Gp, dim_in), jnp.float32),       # pooled-emb accumulator
                            pltpu.VMEM((Gp, 1), jnp.float32)],           # mean node counts
        ),
        compiler_params=pltpu.CompilerParams(
            dimension_semantics=("arbitrary",),
            vmem_limit_bytes=int(vmem_limit_bytes),
        ),
    )(batch_arr, x, w1, b1_2d, a1_2d, w2, b2_2d)

    return out_p[:num_graphs, :]


def graph_head_reference(x, batch_idx, params, *, num_graphs, pooling_type):
    if pooling_type == "add":
        emb = jax.ops.segment_sum(x, batch_idx, num_segments=num_graphs)
    elif pooling_type == "mean":
        s = jax.ops.segment_sum(x, batch_idx, num_segments=num_graphs)
        cnt = jax.ops.segment_sum(jnp.ones((x.shape[0], 1), x.dtype), batch_idx,
                                  num_segments=num_graphs)
        emb = s / jnp.maximum(cnt, 1.0)
    else:
        emb = jax.ops.segment_max(x, batch_idx, num_segments=num_graphs)
    h = emb @ params["w1"] + params["b1"]
    a = params["a1"][0]
    h = jnp.where(h >= 0.0, h, a * h)
    return h @ params["w2"] + params["b2"]


if __name__ == "__main__":
    # Small config consistent with the module:
    #   dim_in=32, dim_out=16, dim_inner=32, num_layers=2
    N, G = 600, 4
    dim_in, dim_inner, dim_out = 32, 32, 16

    key = jax.random.PRNGKey(0)
    kx, k1, k2, k3, k4 = jax.random.split(key, 5)

    x = jax.random.normal(kx, (N, dim_in), dtype=jnp.float32)
    sizes = (100, 200, 250, 50)   # non-power-of-two groups (exercises exact mean)
    batch_idx = jnp.concatenate(
        [jnp.full((s,), g, jnp.int32) for g, s in enumerate(sizes)])

    params = {
        "w1": 0.1 * jax.random.normal(k1, (dim_in, dim_inner), jnp.float32),
        "b1": 0.1 * jax.random.normal(k2, (dim_inner,), jnp.float32),
        "a1": jnp.array([0.25], dtype=jnp.float32),   # torch PReLU default init
        "w2": 0.1 * jax.random.normal(k3, (dim_inner, dim_out), jnp.float32),
        "b2": 0.1 * jax.random.normal(k4, (dim_out,), jnp.float32),
    }

    # tile_n=128 -> 5 node tiles with a ragged final tile (88 rows): exercises
    # the grid, the in-kernel tail masking, and the unpadded-x streaming path.
    for pooling in ("add", "mean", "max"):
        out = graph_head_forward(x, batch_idx, params, num_graphs=G,
                                 pooling_type=pooling, tile_n=128)
        out = jax.block_until_ready(out)
        ref = graph_head_reference(x, batch_idx, params, num_graphs=G,
                                   pooling_type=pooling)
        assert out.shape == (G, dim_out)
        assert jnp.allclose(out, ref, atol=1e-4, rtol=1e-4), \
            f"mismatch vs reference for pooling={pooling}"

    # default (large) tile: TN clamps to N -> single full-extent block path
    out = graph_head_forward(x, batch_idx, params, num_graphs=G,
                             pooling_type="add")
    out = jax.block_until_ready(out)
    ref = graph_head_reference(x, batch_idx, params, num_graphs=G,
                               pooling_type="add")
    assert jnp.allclose(out, ref, atol=1e-4, rtol=1e-4), \
        "mismatch vs reference for single-tile add path"

    print("KERNEL_OK")
</pallas_src>

<mosaic_0001>
module attributes {stable_mosaic.version = 11 : i64} {
  func.func @graph_head_kernel(%arg0: i32, %arg1: memref<1x128xi32, #tpu.memory_space<vmem>>, %arg2: memref<128x32xf32, #tpu.memory_space<vmem>>, %arg3: memref<32x32xf32, #tpu.memory_space<vmem>>, %arg4: memref<1x32xf32, #tpu.memory_space<vmem>>, %arg5: memref<1x1xf32, #tpu.memory_space<smem>>, %arg6: memref<32x16xf32, #tpu.memory_space<vmem>>, %arg7: memref<1x16xf32, #tpu.memory_space<vmem>>, %arg8: memref<8x16xf32, #tpu.memory_space<vmem>>, %arg9: memref<8x32xf32, #tpu.memory_space<vmem>>, %arg10: memref<8x1xf32, #tpu.memory_space<vmem>>) attributes {dimension_semantics = [#tpu.dimension_semantics<arbitrary>], iteration_bounds = array<i64: 5>, scalar_prefetch = 0 : i64, scratch_operands = 2 : i64, tpu.core_type = #tpu.core_type<tc>, window_params = [{transform_indices = @transform_0, window_bounds = array<i64: 1, 128>}, {transform_indices = @transform_1, window_bounds = array<i64: 128, 32>}, {pipeline_mode = #tpu.pipeline_mode<synchronous>, transform_indices = @transform_2, window_bounds = array<i64: 32, 32>}, {pipeline_mode = #tpu.pipeline_mode<synchronous>, transform_indices = @transform_3, window_bounds = array<i64: 1, 32>}, {transform_indices = @transform_4, window_bounds = array<i64: 1, 1>}, {pipeline_mode = #tpu.pipeline_mode<synchronous>, transform_indices = @transform_5, window_bounds = array<i64: 32, 16>}, {pipeline_mode = #tpu.pipeline_mode<synchronous>, transform_indices = @transform_6, window_bounds = array<i64: 1, 16>}, {pipeline_mode = #tpu.pipeline_mode<synchronous>, transform_indices = @transform_7, window_bounds = array<i64: 8, 16>}]} {
    %c0_i32 = arith.constant 0 : i32
    %0 = arith.cmpi eq, %arg0, %c0_i32 : i32
    %1 = arith.extui %0 : i1 to i32
    %c0_i32_0 = arith.constant 0 : i32
    %2 = arith.cmpi ne, %1, %c0_i32_0 : i32
    scf.if %2 {
      %cst_12 = arith.constant 0.000000e+00 : f32
      %36 = vector.broadcast %cst_12 : f32 to vector<8x32xf32>
      %c0_13 = arith.constant 0 : index
      %c0_14 = arith.constant 0 : index
      %37 = vector.load %arg9[%c0_13, %c0_14] : memref<8x32xf32, #tpu.memory_space<vmem>>, vector<8x32xf32>
      tpu.vector_store %arg9[%c0_13, %c0_14], %36 {strides = array<i32>} : memref<8x32xf32, #tpu.memory_space<vmem>>, vector<8x32xf32>,
    } else {
    }
    %c0 = arith.constant 0 : index
    %c0_1 = arith.constant 0 : index
    %3 = vector.load %arg1[%c0, %c0_1] : memref<1x128xi32, #tpu.memory_space<vmem>>, vector<1x128xi32>
    %c128_i32 = arith.constant 128 : i32
    %4 = arith.muli %arg0, %c128_i32 : i32
    %5 = tpu.iota {dimensions = array<i32: 1>} : vector<1x128xi32>
    %6 = vector.broadcast %4 : i32 to vector<1x128xi32>
    %7 = arith.addi %6, %5 : vector<1x128xi32>
    %c600_i32 = arith.constant 600 : i32
    %8 = vector.broadcast %c600_i32 : i32 to vector<1x128xi32>
    %9 = arith.cmpi slt, %7, %8 : vector<1x128xi32>
    %10 = tpu.iota {dimensions = array<i32: 0>} : vector<8x128xi32>
    %11 = vector.broadcast %3 : vector<1x128xi32> to vector<8x128xi32>
    %12 = arith.cmpi eq, %11, %10 : vector<8x128xi32>
    %13 = vector.broadcast %9 : vector<1x128xi1> to vector<8x128xi1>
    %14 = arith.andi %12, %13 : vector<8x128xi1>
    %c0_2 = arith.constant 0 : index
    %c0_3 = arith.constant 0 : index
    %15 = vector.load %arg2[%c0_2, %c0_3] : memref<128x32xf32, #tpu.memory_space<vmem>>, vector<128x32xf32>
    %c128_i32_4 = arith.constant 128 : i32
    %16 = arith.muli %arg0, %c128_i32_4 : i32
    %17 = tpu.iota {dimensions = array<i32: 0>} : vector<128x1xi32>
    %18 = vector.broadcast %16 : i32 to vector<128x1xi32>
    %19 = arith.addi %18, %17 : vector<128x1xi32>
    %c600_i32_5 = arith.constant 600 : i32
    %20 = vector.broadcast %c600_i32_5 : i32 to vector<128x1xi32>
    %21 = arith.cmpi slt, %19, %20 : vector<128x1xi32>
    %c0_i32_6 = arith.constant 0 : i32
    %22 = arith.sitofp %c0_i32_6 : i32 to f32
    %23 = vector.shape_cast %21 : vector<128x1xi1> to vector<128x1xi1>
    %24 = vector.broadcast %23 : vector<128x1xi1> to vector<128x32xi1>
    %25 = vector.broadcast %22 : f32 to vector<128x32xf32>
    %26 = arith.select %24, %15, %25 : vector<128x32xi1>, vector<128x32xf32>
    %27 = arith.extui %14 : vector<8x128xi1> to vector<8x128xi32>
    %28 = arith.sitofp %27 : vector<8x128xi32> to vector<8x128xf32>
    %c0_7 = arith.constant 0 : index
    %c0_8 = arith.constant 0 : index
    %29 = vector.load %arg9[%c0_7, %c0_8] : memref<8x32xf32, #tpu.memory_space<vmem>>, vector<8x32xf32>
    %cst = arith.constant dense<0.000000e+00> : vector<8x32xf32>
    %30 = tpu.matmul %28, %26, %cst {dimension_numbers = #tpu.dot_dimension_numbers<[1], [0], [0], [1], [0, 0, 1, 1], [], []>} : vector<8x128xf32>, vector<128x32xf32>, vector<8x32xf32> -> vector<8x32xf32>
    %31 = arith.addf %29, %30 : vector<8x32xf32>
    %c0_9 = arith.constant 0 : index
    %c0_10 = arith.constant 0 : index
    %32 = vector.load %arg9[%c0_9, %c0_10] : memref<8x32xf32, #tpu.memory_space<vmem>>, vector<8x32xf32>
    tpu.vector_store %arg9[%c0_9, %c0_10], %31 {strides = array<i32>} : memref<8x32xf32, #tpu.memory_space<vmem>>, vector<8x32xf32>,
    %c4_i32 = arith.constant 4 : i32
    %33 = arith.cmpi eq, %arg0, %c4_i32 : i32
    %34 = arith.extui %33 : i1 to i32
    %c0_i32_11 = arith.constant 0 : i32
    %35 = arith.cmpi ne, %34, %c0_i32_11 : i32
    scf.if %35 {
      %c0_12 = arith.constant 0 : index
      %c0_13 = arith.constant 0 : index
      %36 = vector.load %arg9[%c0_12, %c0_13] : memref<8x32xf32, #tpu.memory_space<vmem>>, vector<8x32xf32>
      %c0_14 = arith.constant 0 : index
      %c0_15 = arith.constant 0 : index
      %37 = vector.load %arg3[%c0_14, %c0_15] : memref<32x32xf32, #tpu.memory_space<vmem>>, vector<32x32xf32>
      %cst_16 = arith.constant dense<0.000000e+00> : vector<8x32xf32>
      %38 = tpu.matmul %36, %37, %cst_16 {dimension_numbers = #tpu.dot_dimension_numbers<[1], [0], [0], [1], [0, 0, 1, 1], [], []>} : vector<8x32xf32>, vector<32x32xf32>, vector<8x32xf32> -> vector<8x32xf32>
      %c0_17 = arith.constant 0 : index
      %c0_18 = arith.constant 0 : index
      %39 = vector.load %arg4[%c0_17, %c0_18] : memref<1x32xf32, #tpu.memory_space<vmem>>, vector<1x32xf32>
      %40 = vector.broadcast %39 : vector<1x32xf32> to vector<8x32xf32>
      %41 = arith.addf %38, %40 : vector<8x32xf32>
      %c0_19 = arith.constant 0 : index
      %c0_20 = arith.constant 0 : index
      %42 = memref.load %arg5[%c0_19, %c0_20] : memref<1x1xf32, #tpu.memory_space<smem>>
      %cst_21 = arith.constant 0.000000e+00 : f32
      %43 = vector.broadcast %cst_21 : f32 to vector<8x32xf32>
      %44 = arith.cmpf oge, %41, %43 : vector<8x32xf32>
      %45 = vector.broadcast %42 : f32 to vector<8x32xf32>
      %46 = arith.mulf %45, %41 : vector<8x32xf32>
      %47 = arith.select %44, %41, %46 : vector<8x32xi1>, vector<8x32xf32>
      %c0_22 = arith.constant 0 : index
      %c0_23 = arith.constant 0 : index
      %48 = vector.load %arg6[%c0_22, %c0_23] : memref<32x16xf32, #tpu.memory_space<vmem>>, vector<32x16xf32>
      %cst_24 = arith.constant dense<0.000000e+00> : vector<8x16xf32>
      %49 = tpu.matmul %47, %48, %cst_24 {dimension_numbers = #tpu.dot_dimension_numbers<[1], [0], [0], [1], [0, 0, 1, 1], [], []>} : vector<8x32xf32>, vector<32x16xf32>, vector<8x16xf32> -> vector<8x16xf32>
      %c0_25 = arith.constant 0 : index
      %c0_26 = arith.constant 0 : index
      %50 = vector.load %arg7[%c0_25, %c0_26] : memref<1x16xf32, #tpu.memory_space<vmem>>, vector<1x16xf32>
      %51 = vector.broadcast %50 : vector<1x16xf32> to vector<8x16xf32>
      %52 = arith.addf %49, %51 : vector<8x16xf32>
      %c0_27 = arith.constant 0 : index
      %c0_28 = arith.constant 0 : index
      %53 = vector.load %arg8[%c0_27, %c0_28] : memref<8x16xf32, #tpu.memory_space<vmem>>, vector<8x16xf32>
      tpu.vector_store %arg8[%c0_27, %c0_28], %52 {strides = array<i32>} : memref<8x16xf32, #tpu.memory_space<vmem>>, vector<8x16xf32>,
    } else {
    }
    return
  }
  func.func @transform_0(%arg0: i32) -> (i32, i32) {
    %c0_i32 = arith.constant 0 : i32
    %c0_i32_0 = arith.constant 0 : i32
    return %c0_i32, %arg0 : i32, i32
  }
  func.func @transform_1(%arg0: i32) -> (i32, i32) {
    %c0_i32 = arith.constant 0 : i32
    %c0_i32_0 = arith.constant 0 : i32
    return %arg0, %c0_i32 : i32, i32
  }
  func.func @transform_2(%arg0: i32) -> (i32, i32) {
    %c0_i32 = arith.constant 0 : i32
    %c0_i32_0 = arith.constant 0 : i32
    %c0_i32_1 = arith.constant 0 : i32
    return %c0_i32, %c0_i32_0 : i32, i32
  }
  func.func @transform_3(%arg0: i32) -> (i32, i32) {
    %c0_i32 = arith.constant 0 : i32
    %c0_i32_0 = arith.constant 0 : i32
    %c0_i32_1 = arith.constant 0 : i32
    return %c0_i32, %c0_i32_0 : i32, i32
  }
  func.func @transform_4(%arg0: i32) -> (i32, i32) {
    %c0_i32 = arith.constant 0 : i32
    %c0_i32_0 = arith.constant 0 : i32
    %c0_i32_1 = arith.constant 0 : i32
    return %c0_i32, %c0_i32_0 : i32, i32
  }
  func.func @transform_5(%arg0: i32) -> (i32, i32) {
    %c0_i32 = arith.constant 0 : i32
    %c0_i32_0 = arith.constant 0 : i32
    %c0_i32_1 = arith.constant 0 : i32
    return %c0_i32, %c0_i32_0 : i32, i32
  }
  func.func @transform_6(%arg0: i32) -> (i32, i32) {
    %c0_i32 = arith.constant 0 : i32
    %c0_i32_0 = arith.constant 0 : i32
    %c0_i32_1 = arith.constant 0 : i32
    return %c0_i32, %c0_i32_0 : i32, i32
  }
  func.func @transform_7(%arg0: i32) -> (i32, i32) {
    %c0_i32 = arith.constant 0 : i32
    %c0_i32_0 = arith.constant 0 : i32
    %c0_i32_1 = arith.constant 0 : i32
    return %c0_i32, %c0_i32_0 : i32, i32
  }
}

</mosaic_0001>

<bundles_post_ra>
// kernel: tpu_custom_call.1
= control target key start
LH: loop header
LB: loop body
LE: loop exit
PB: predicated region body
PF: predicated region fallthrough
CT: control target
= control target key end

     0   :  { %s1127_s0 = inlined_call_operand.vmem [shape: s32[1,600], index: 0, kind: input, shape index: {}]   ;;  %s1128_s1 = inlined_call_operand.vmem [shape: f32[600,32], index: 1, kind: input, shape index: {}]   ;;  %s1129_s2 = inlined_call_operand.vmem [shape: f32[32,32], index: 2, kind: input, shape index: {}]   ;;  %s1130_s3 = inlined_call_operand.vmem [shape: f32[1,32], index: 3, kind: input, shape index: {}]   ;;  %s1131_s4 = inlined_call_operand.<no memory space> [shape: f32[1,1], index: 4, kind: input, shape index: {}]   ;;  %s1132_s5 = inlined_call_operand.vmem [shape: f32[32,16], index: 5, kind: input, shape index: {}]   ;;  %s1133_s6 = inlined_call_operand.vmem [shape: f32[1,16], index: 6, kind: input, shape index: {}]   ;;  %s1134_s7 = inlined_call_operand.hbm [shape: f32[8,16], index: 7, kind: output, shape index: {}]  }
   0x1   :  { %12 = sst [smem:[#allocation4]] %s1131_s4 }
   0x2   :  { %13 = vsyncpa [#allocation6], 0  ;;  %s974_s26 = smov 0  }
   0x3 LB: > { %s980_s27 = sadd.s32 4294967295, %s922_s26   ;;  %p750_p0 = scmp.ge.s32.totalorder %s922_s26, 1  ;;  %s922_s26 = sphi %s974_s26, %s19_s26  }
   0x4   : > { %p251_p1 = scmp.lt.s32.totalorder %s922_s26, 6 }
   0x6   : > { %p252_p2 = pnand %p750_p0, %p251_p1 }
   0x7   : > { %p285_p3 = scmp.lt.s32.totalorder (!%p252_p2), %s980_s27, 4  ;;  %s751_s4 = sshll.u32 (!%p252_p2), %s980_s27, 4 }
   0x8   : > { %255 = sbr.rel (%p252_p2) target bundleno = 675 (0x2a3), region = 48  ;;  %p293_p4 = scmp.lt.s32.totalorder (!%p252_p2), %s751_s4, 74 }
   0x9   : > { %p753_p5 = scmp.ne.s32.totalorder (!%p252_p2), %s980_s27, 0 }
   0xd   : > { %s987_s28 = scalar_select %p285_p3, %s980_s27, 4 }
   0xe   : > { %s1136_s4 = smov (!%p293_p4, %s751_s4), 74  ;;  %305 = sbr.rel (%p753_p5) target bundleno = 21 (0x15), region = 52 }
   0xf   : > { %s287_s8 = scalar_lea.vmem %s1127_s0, %s987_s28  ;;  %s752_s9 = sshll.u32 %s1136_s4, 3 }
  0x10   : > { %s996_s12 = scalar_lea.vmem %s1128_s1, %s752_s9 }
  0x13   : > { %vm306_vm0 = vcmask 261120   ;;  %v924_v0 = vmov 0.0  }
  0x14   : > { %307 = vst.msk [vmem:[#allocation2] sm:$0xff] %vm306_vm0, %v924_v0 }
  0x15 PF: > { %s754_s13 = sshll.u32 %s980_s27, 7  ;;  %v310_v1 = vlaneseq  ;;  %v925_v2 = vmov 0.0   ;;  %vm926_vm1 = vmmov 0   ;;  %v340_v9 = vld [vmem:[%s996_s12 + $0x78] sm:$0xff]  ;;  %v339_v14 = vld [vmem:[%s996_s12 + $0x70] sm:$0xff]  ;;  %v338_v17 = vld [vmem:[%s996_s12 + $0x68] sm:$0xff] }
  0x16   : > { %810 = vmatprep.subr.mxu0 %v925_v2  ;;  %842 = vmatprep.mubr.msk.f32.mxu0 %vm926_vm1, %v925_v2  ;;  %v1005_v4 = vstv %s754_s13  ;;  %v337_v20 = vld [vmem:[%s996_s12 + $0x60] sm:$0xff]  ;;  %v336_v23 = vld [vmem:[%s996_s12 + $0x58] sm:$0xff]  ;;  %v335_v26 = vld [vmem:[%s996_s12 + $0x50] sm:$0xff]  ;;  %v927_v55 = vmov 1.0   ;;  %p774_p6 = scmp.ne.s32.totalorder %s980_s27, 4 }
  0x17   : > { %v1003_v3 = vshrl.u32 %v310_v1, 7  ;;  %v334_v29 = vld [vmem:[%s996_s12 + $0x48] sm:$0xff]  ;;  %v333_v32 = vld [vmem:[%s996_s12 + $0x40] sm:$0xff]  ;;  %v332_v35 = vld [vmem:[%s996_s12 + $0x38] sm:$0xff]  ;;  %v311_v44 = vand.u32 127, %v310_v1  ;;  %s601_s10 = sld [smem:[#allocation4]] (!%p774_p6) }
  0x18   : > { %v331_v38 = vld [vmem:[%s996_s12 + $0x30] sm:$0xff]  ;;  %v330_v41 = vld [vmem:[%s996_s12 + $0x28] sm:$0xff]  ;;  %v329_v45 = vld [vmem:[%s996_s12 + $0x20] sm:$0xff] }
  0x19   : > { %v355_v5 = vadd.s32 120, %v1003_v3  ;;  %v354_v6 = vadd.s32 112, %v1003_v3  ;;  %v353_v7 = vadd.s32 104, %v1003_v3  ;;  %v352_v8 = vadd.s32 96, %v1003_v3  ;;  %v328_v47 = vld [vmem:[%s996_s12 + $0x18] sm:$0xff]  ;;  %v327_v51 = vld [vmem:[%s996_s12 + $0x10] sm:$0xff] }
  0x1a   : > { %v351_v13 = vadd.s32 88, %v1003_v3  ;;  %v350_v16 = vadd.s32 80, %v1003_v3  ;;  %v349_v19 = vadd.s32 72, %v1003_v3  ;;  %v348_v22 = vadd.s32 64, %v1003_v3  ;;  %v755_v50 = vld [vmem:[%s287_s8] ss:$0 sm:$0xff] }
  0x1b   : > { %v371_v10 = vadd.s32 %v355_v5, %v1005_v4  ;;  %v370_v11 = vadd.s32 %v354_v6, %v1005_v4  ;;  %v369_v12 = vadd.s32 %v353_v7, %v1005_v4  ;;  %v368_v15 = vadd.s32 %v352_v8, %v1005_v4  ;;  %v326_v53 = vld [vmem:[%s996_s12 + $0x8] sm:$0xff]  ;;  %v325_v54 = vld [vmem:[%s996_s12] sm:$0xff] }
  0x1c   : > { %v367_v18 = vadd.s32 %v351_v13, %v1005_v4  ;;  %v366_v21 = vadd.s32 %v350_v16, %v1005_v4  ;;  %v365_v24 = vadd.s32 %v349_v19, %v1005_v4  ;;  %v347_v25 = vadd.s32 56, %v1003_v3  ;;  %v438_v56 = vld [vmem:[#allocation2] sm:$0xff] }
  0x1d   : > { %vm387_vm2 = vcmp.lt.s32.totalorder %v371_v10, 600  ;;  %vm386_vm3 = vcmp.lt.s32.totalorder %v370_v11, 600  ;;  %vm385_vm4 = vcmp.lt.s32.totalorder %v369_v12, 600  ;;  %vm384_vm5 = vcmp.lt.s32.totalorder %v368_v15, 600 }
  0x1e   : > { %811 = vmatpush3.msk.msra.mxu0 %vm387_vm2, %v340_v9  ;;  %vm383_vm6 = vcmp.lt.s32.totalorder %v367_v18, 600  ;;  %vm382_vm7 = vcmp.lt.s32.totalorder %v366_v21, 600  ;;  %v364_v27 = vadd.s32 %v348_v22, %v1005_v4  ;;  %v346_v28 = vadd.s32 48, %v1003_v3 }
  0x1f   : > { %812 = vmatprep.subr.mxu0 %v925_v2  ;;  %vm381_vm8 = vcmp.lt.s32.totalorder %v365_v24, 600  ;;  %v363_v30 = vadd.s32 %v347_v25, %v1005_v4  ;;  %v345_v31 = vadd.s32 40, %v1003_v3  ;;  %v344_v34 = vadd.s32 32, %v1003_v3 }
  0x20   : > { %813 = vmatpush3.msk.msra.mxu0 %vm386_vm3, %v339_v14  ;;  %vm380_vm9 = vcmp.lt.s32.totalorder %v364_v27, 600  ;;  %v362_v33 = vadd.s32 %v346_v28, %v1005_v4  ;;  %v343_v37 = vadd.s32 24, %v1003_v3  ;;  %v342_v40 = vadd.s32 16, %v1003_v3 }
  0x21   : > { %814 = vmatprep.subr.mxu0 %v925_v2  ;;  %vm379_vm10 = vcmp.lt.s32.totalorder %v363_v30, 600  ;;  %v361_v36 = vadd.s32 %v345_v31, %v1005_v4  ;;  %v360_v39 = vadd.s32 %v344_v34, %v1005_v4  ;;  %v341_v43 = vadd.s32 8, %v1003_v3 }
  0x22   : > { %815 = vmatpush3.msk.msra.mxu0 %vm385_vm4, %v338_v17  ;;  %vm378_vm11 = vcmp.lt.s32.totalorder %v362_v33, 600  ;;  %v359_v42 = vadd.s32 %v343_v37, %v1005_v4  ;;  %v358_v46 = vadd.s32 %v342_v40, %v1005_v4  ;;  %v313_v49 = vadd.s32 %v1005_v4, %v311_v44 }
  0x23   : > { %816 = vmatprep.subr.mxu0 %v925_v2  ;;  %vm377_vm12 = vcmp.lt.s32.totalorder %v361_v36, 600  ;;  %vm376_vm13 = vcmp.lt.s32.totalorder %v360_v39, 600  ;;  %v357_v48 = vadd.s32 %v341_v43, %v1005_v4  ;;  %v356_v52 = vadd.s32 %v1003_v3, %v1005_v4 }
  0x24   : > { %817 = vmatpush3.msk.msra.mxu0 %vm384_vm5, %v337_v20  ;;  %vm375_vm14 = vcmp.lt.s32.totalorder %v359_v42, 600  ;;  %vm374_vm15 = vcmp.lt.s32.totalorder %v358_v46, 600  ;;  %vm314_vm1 = vcmp.lt.s32.totalorder %v313_v49, 600  ;;  %vm321_vm2 = vcmp.eq.s32.totalorder %v755_v50, %v1003_v3 }
  0x25   : > { %818 = vmatprep.subr.mxu0 %v925_v2  ;;  %vm373_vm0 = vcmp.lt.s32.totalorder %v357_v48, 600  ;;  %vm372_vm3 = vcmp.lt.s32.totalorder %v356_v52, 600  ;;  %vm324_vm4 = vmand %vm321_vm2, %vm314_vm1  ;;  %vm510_vm5 = vcmask 261120  }
  0x26   : > { %819 = vmatpush3.msk.msra.mxu0 %vm383_vm6, %v336_v23 }
  0x27   : > { %820 = vmatprep.subr.mxu0 %v925_v2 }
  0x28   : > { %821 = vmatpush3.msk.msra.mxu0 %vm382_vm7, %v335_v26 }
  0x29   : > { %822 = vmatprep.subr.mxu0 %v925_v2 }
  0x2a   : > { %823 = vmatpush3.msk.msra.mxu0 %vm381_vm8, %v334_v29 }
  0x2b   : > { %824 = vmatprep.subr.mxu0 %v925_v2 }
  0x2c   : > { %825 = vmatpush3.msk.msra.mxu0 %vm380_vm9, %v333_v32 }
  0x2d   : > { %826 = vmatprep.subr.mxu0 %v925_v2 }
  0x2e   : > { %827 = vmatpush3.msk.msra.mxu0 %vm379_vm10, %v332_v35 }
  0x2f   : > { %828 = vmatprep.subr.mxu0 %v925_v2 }
  0x30   : > { %829 = vmatpush3.msk.msra.mxu0 %vm378_vm11, %v331_v38 }
  0x31   : > { %830 = vmatprep.subr.mxu0 %v925_v2 }
  0x32   : > { %831 = vmatpush3.msk.msra.mxu0 %vm377_vm12, %v330_v41 }
  0x33   : > { %832 = vmatprep.subr.mxu0 %v925_v2 }
  0x34   : > { %833 = vmatpush3.msk.msra.mxu0 %vm376_vm13, %v329_v45 }
  0x35   : > { %834 = vmatprep.subr.mxu0 %v925_v2 }
  0x36   : > { %835 = vmatpush3.msk.msra.mxu0 %vm375_vm14, %v328_v47 }
  0x37   : > { %836 = vmatprep.subr.mxu0 %v925_v2 }
  0x38   : > { %837 = vmatpush3.msk.msra.mxu0 %vm374_vm15, %v327_v51 }
  0x39   : > { %838 = vmatprep.subr.mxu0 %v925_v2 }
  0x3a   : > { %839 = vmatpush3.msk.msra.mxu0 %vm373_vm0, %v326_v53 }
  0x3b   : > { %840 = vmatprep.subr.mxu0 %v925_v2 }
  0x3c   : > { %841 = vmatpush3.msk.msra.mxu0 %vm372_vm3, %v325_v54 }
  0x3d   : > { %843 = vmatmul.mubr.msk.f32.vlgmr.msra.gmra.mxu0 %vm324_vm4, %v927_v55 }
  0xfc   : > { %515 = sbr.rel (%p774_p6) target bundleno = 660 (0x294), region = 56 }
  0xfd   : > { %v505_v57 = vpop.f32.mrf.mxu0 }
  0xfe   : > { %v509_v58 = vadd.f32 %v505_v57, %v438_v56 }
  0xff   : > { %v844_v59 = vpop.f32.mrf.mxu0 }
 0x100   : > { %511 = vst.msk [vmem:[#allocation2] sm:$0xff] %vm510_vm5, %v509_v58 }
 0x101   : > { %v520_v60 = vld [vmem:[%s1129_s2 + $0x18] sm:$0xff]  ;;  %v928_v61 = vmov 0.0   ;;  %v519_v62 = vld [vmem:[%s1129_s2 + $0x10] sm:$0xff]  ;;  %vm929_vm6 = vmmov 0   ;;  %v518_v0 = vld [vmem:[%s1129_s2 + $0x8] sm:$0xff]  ;;  %v603_v8 = vstv %s601_s10  ;;  %vm690_vm8 = vcmask 130048  }
 0x102   : > { %845 = vmatprep.subr.mxu0 %v928_v61  ;;  %853 = vmatprep.mubr.msk.f32.mxu0 %vm929_vm6, %v928_v61  ;;  %v609_v63 = vld [vmem:[%s1132_s5 + $0x18] sm:$0xff]  ;;  %v517_v1 = vld [vmem:[%s1129_s2] sm:$0xff]  ;;  %v608_v3 = vld [vmem:[%s1132_s5 + $0x10] sm:$0xff] }
 0x103   : > { %846 = vmatpush3.msra.mxu0 %v520_v60  ;;  %856 = vmatprep.subr.mxu1 %v928_v61  ;;  %v607_v4 = vld [vmem:[%s1132_s5 + $0x8] sm:$0xff]  ;;  %v606_v5 = vld [vmem:[%s1132_s5] sm:$0xff] }
 0x104   : > { %847 = vmatprep.subr.mxu0 %v928_v61  ;;  %857 = vmatpush3.msra.mxu1 %v609_v63  ;;  %v775_v6 = vld [vmem:[%s1130_s3] ss:$0 sm:$0xff] }
 0x105   : > { %848 = vmatpush3.msra.mxu0 %v519_v62  ;;  %858 = vmatprep.subr.mxu1 %v928_v61  ;;  %v777_v13 = vld [vmem:[%s1133_s6] ss:$0 sm:$0xff] }
 0x106   : > { %849 = vmatprep.subr.mxu0 %v928_v61  ;;  %864 = vmatprep.mubr.msk.f32.mxu1 %vm929_vm6, %v928_v61 }
 0x107   : > { %850 = vmatpush3.msra.mxu0 %v518_v0  ;;  %v516_v2 = vld [vmem:[#allocation2] sm:$0xff]  ;;  %859 = vmatpush3.msra.mxu1 %v608_v3 }
 0x108   : > { %851 = vmatprep.subr.mxu0 %v928_v61  ;;  %860 = vmatprep.subr.mxu1 %v928_v61 }
 0x109   : > { %852 = vmatpush3.msra.mxu0 %v517_v1  ;;  %861 = vmatpush3.msra.mxu1 %v607_v4 }
 0x10a   : > { %854 = vmatmul.mubr.msk.f32.vlgmr.msra.gmra.mxu0 %vm510_vm5, %v516_v2  ;;  %862 = vmatprep.subr.mxu1 %v928_v61 }
 0x10b   : > { %863 = vmatpush3.msra.mxu1 %v606_v5 }
 0x1ca   : > { %v597_v7 = vpop.f32.mrf.mxu0 }
 0x1cb   : > { %v598_v9 = vadd.f32 %v775_v6, %v597_v7 }
 0x1cc   : > { %v855_v10 = vpop.f32.mrf.mxu0 }
 0x1cd   : > { %v604_v11 = vmul.f32 %v603_v8, %v598_v9  ;;  %vm602_vm7 = vcmp.ge.f32.partialorder %v598_v9, 0.0 }
 0x1cf   : > { %v605_v12 = vsel %vm602_vm7, %v598_v9, %v604_v11 }
 0x1d0   : > { %865 = vmatmul.mubr.msk.f32.vlgmr.msra.gmra.mxu1 %vm510_vm5, %v605_v12 }
 0x290   : > { %v686_v14 = vpop.f32.mrf.mxu1 }
 0x291   : > { %v687_v15 = vadd.f32 %v777_v13, %v686_v14 }
 0x292   : > { %v866_v16 = vpop.f32.mrf.mxu1 }
 0x293   : > { %691 = vst.msk [vmem:[#allocation5] sm:$0xff] %vm690_vm8, %v687_v15 }
 0x294 PF: > { %p871_p7 = scmp.eq.s32.totalorder %s980_s27, 4  ;;  %s930_s15 = smov [#allocation5]  }
 0x295   : > { %s699_s16 = sshll.u32 %s930_s15, 4  ;;  %s700_s16 = int_to_ptr.vmem [resolvable:$true] %s699_s16 }
 0x296   : > { %s888_s17 = scalar_lea.vmem %s700_s16, 128  ;;  %p895_p11 = scmp.lt.s32.totalorder %s700_s16, %s700_s16 }
 0x297   : > { %p889_p8 = scmp.ne.s32.totalorder %s700_s16, %s888_s17  ;;  %p896_p12 = scmp.lt.s32.totalorder %s888_s17, %s888_s17 }
 0x299   : > { %p890_p9 = pnand %p889_p8, %p871_p7  ;;  %p897_p13 = por %p896_p12, %p895_p11 }
 0x29b   : > { %p891_p10 = pneg %p890_p9 }
 0x29d   : > { %p898_p0 = pnand %p897_p13, %p891_p10 }
 0x29f   : > { %901 = shalt.err (!%p898_p0)
}
 0x2a0   : > { %868 = dma.vmem_to_hbm [thread:$0]  (%p871_p7), %s700_s16, 128, %s1134_s7, [#allocation6]  }
 0x2a1   : > { %917 = dma.done.wait (%p871_p7), [#allocation6], 128  }
 0x2a2   : > { %919 = vsyncadd (%p871_p7), [#allocation6], 4294967168 }
 0x2a3 PF: > { %s19_s26 = sadd.s32 1, %s922_s26  }
 0x2a4   : > { %p16_p1 = scmp.ge.s32.totalorder %s19_s26, 7  }
 0x2a6   :  { %18 = sbr.rel (!%p16_p1) target bundleno = 3 (0x3), region = 86 }
 0x2ab   :  { %712 = vsyncpa [#allocation6], 1 }
 0x2ac   :  { %714 = vsyncpa [#allocation6 + $0x1], 1 }

</bundles_post_ra>
